<compile_context>
chip_gen: v6e
topology: v6e:2x2x1
jax: 0.10.0
libtpu: 0.0.40
codegen_flags: <defaults>
</compile_context>

<pallas_src>
import math
import functools

import jax
import jax.numpy as jnp
from jax.experimental import pallas as pl
from jax.experimental.pallas import tpu as pltpu


def _graph_edge_kernel(x_ref, w_ref, o_ref, *, Di, Dp):
    # x_ref: (1, L, D)   one batch element per grid step
    # w_ref: (D, 2*Dp)   fused projection [Wq^T*scale | 0-pad | Wk^T | 0-pad]
    # o_ref: (1, L, L)   softmax(q k^T * scale) over the last axis
    x = x_ref[0]                                                     # (L, D)

    # One MXU matmul yields both projections.  Each half starts on a 128-lane
    # boundary (Dp is a multiple of 128), so the slices below need no
    # cross-lane relayout before the second matmul.
    qk = jnp.dot(x, w_ref[...], preferred_element_type=jnp.float32)  # (L, 2*Dp)
    q = qk[:, :Di]                    # softmax scale already folded into Wq
    k = qk[:, Dp:Dp + Di]             # starts at lane Dp (multiple of 128)

    # q @ k^T without an explicit transpose: contract the feature dim.
    s = jax.lax.dot_general(
        q, k,
        dimension_numbers=(((1,), (1,)), ((), ())),
        preferred_element_type=jnp.float32)                          # (L, L)

    # Numerically-stable softmax over the last axis (all f32 on VPU/EUP).
    m = jnp.max(s, axis=-1, keepdims=True)
    e = jnp.exp(s - m)
    denom = jnp.sum(e, axis=-1, keepdims=True)
    inv = pl.reciprocal(denom, approx=True)        # EUP slot, co-issues
    # Two Newton steps restore exact-f32 row normalization (rows sum to 1 to
    # ~1e-7) while keeping the divide off the VALU.
    inv = inv * (2.0 - denom * inv)
    inv = inv * (2.0 - denom * inv)
    o_ref[0] = (e * inv).astype(o_ref.dtype)


def prepare_qk_weight(w_qk, *, heads, dim_head):
    """One-time parameter prep (hoisted out of the per-forward path).

    w_qk: (2*inner_dim, dim) PyTorch nn.Linear weight for to_qk.
    Returns (w_fused, Dp):
      w_fused: (dim, 2*Dp) with [ Wq^T * dim_head**-0.5 | 0 | Wk^T | 0 ],
               each half padded to Dp lanes (multiple of 128).
    """
    inner_dim = heads * dim_head
    two_inner, D = w_qk.shape
    assert two_inner == 2 * inner_dim
    scale = dim_head ** (-0.5)
    Dp = max(128, ((inner_dim + 127) // 128) * 128)

    wq = w_qk[:inner_dim, :].T * scale             # (D, inner_dim), pre-scaled
    wk = w_qk[inner_dim:, :].T                     # (D, inner_dim)
    w_fused = jnp.zeros((D, 2 * Dp), dtype=w_qk.dtype)
    w_fused = w_fused.at[:, :inner_dim].set(wq)
    w_fused = w_fused.at[:, Dp:Dp + inner_dim].set(wk)
    return w_fused, Dp


@functools.partial(jax.jit, static_argnames=("inner_dim", "Dp"))
def graph_edge_feature(x, w_fused, *, inner_dim, Dp):
    """x: (B, L, dim) float32; w_fused from prepare_qk_weight (built once)."""
    B, L, D = x.shape
    assert w_fused.shape == (D, 2 * Dp)

    kernel = functools.partial(_graph_edge_kernel, Di=inner_dim, Dp=Dp)

    itemsize = jnp.dtype(x.dtype).itemsize
    cost = pl.CostEstimate(
        flops=2 * B * L * D * (2 * Dp) + 2 * B * L * L * inner_dim,
        transcendentals=B * L * L + B * L,          # exp + reciprocal
        bytes_accessed=(x.size + w_fused.size + B * L * L) * itemsize)

    return pl.pallas_call(
        kernel,
        out_shape=jax.ShapeDtypeStruct((B, L, L), x.dtype),
        grid=(B,),
        in_specs=[
            pl.BlockSpec((1, L, D), lambda b: (b, 0, 0)),
            pl.BlockSpec((D, 2 * Dp), lambda b: (0, 0)),
        ],
        out_specs=pl.BlockSpec((1, L, L), lambda b: (b, 0, 0)),
        compiler_params=pltpu.CompilerParams(
            dimension_semantics=("parallel",)),      # megacore shard on v7x
        cost_estimate=cost,
    )(x, w_fused)


def _reference(x, w_qk, *, heads, dim_head):
    inner_dim = heads * dim_head
    qk = jnp.einsum('bld,nd->bln', x, w_qk)          # Linear, no bias
    q, k = qk[..., :inner_dim], qk[..., inner_dim:]
    attn = jnp.einsum('bqc,bkc->bqk', q, k) * (dim_head ** -0.5)
    return jax.nn.softmax(attn, axis=-1)


if __name__ == "__main__":
    # Small config consistent with the module's __init__:
    #   dim=32, heads=4, dim_head=8 -> inner_dim=32; batch=2, seq len=16
    B, L, dim = 2, 16, 32
    heads, dim_head, num_layers = 4, 8, 24
    inner_dim = heads * dim_head

    key = jax.random.PRNGKey(0)
    kx, kw = jax.random.split(key)
    x = jax.random.normal(kx, (B, L, dim), dtype=jnp.float32)
    # nn.Linear weight init per init_params: normal(0, 0.02/sqrt(num_layers))
    w_qk = (0.02 / math.sqrt(num_layers)) * jax.random.normal(
        kw, (2 * inner_dim, dim), dtype=jnp.float32)

    # Parameter prep happens ONCE, outside the per-forward path.
    w_fused, Dp = prepare_qk_weight(w_qk, heads=heads, dim_head=dim_head)
    w_fused = jax.block_until_ready(w_fused)

    attn = graph_edge_feature(x, w_fused, inner_dim=inner_dim, Dp=Dp)
    attn = jax.block_until_ready(attn)

    ref = _reference(x, w_qk, heads=heads, dim_head=dim_head)
    assert attn.shape == (B, L, L)
    # Newton-refined reciprocal gives essentially exact f32 normalization, so
    # tolerances are tight again.
    assert jnp.allclose(attn, ref, atol=1e-4, rtol=1e-4)
    assert jnp.allclose(jnp.sum(attn, axis=-1), 1.0, atol=1e-4)
    print("KERNEL_OK")
</pallas_src>

<mosaic_0001>
module attributes {stable_mosaic.version = 11 : i64} {
  func.func @_graph_edge_kernel(%arg0: i32, %arg1: memref<1x16x32xf32, #tpu.memory_space<vmem>>, %arg2: memref<32x256xf32, #tpu.memory_space<vmem>>, %arg3: memref<1x16x16xf32, #tpu.memory_space<vmem>>) attributes {dimension_semantics = [#tpu.dimension_semantics<parallel>], iteration_bounds = array<i64: 2>, scalar_prefetch = 0 : i64, scratch_operands = 0 : i64, tpu.core_type = #tpu.core_type<tc>, window_params = [{transform_indices = @transform_0, window_bounds = array<i64: 1, 16, 32>}, {pipeline_mode = #tpu.pipeline_mode<synchronous>, transform_indices = @transform_1, window_bounds = array<i64: 32, 256>}, {transform_indices = @transform_2, window_bounds = array<i64: 1, 16, 16>}]} {
    %c0 = arith.constant 0 : index
    %c0_0 = arith.constant 0 : index
    %c0_1 = arith.constant 0 : index
    %0 = vector.load %arg1[%c0, %c0_0, %c0_1] : memref<1x16x32xf32, #tpu.memory_space<vmem>>, vector<1x16x32xf32>
    %1 = vector.shape_cast %0 : vector<1x16x32xf32> to vector<16x32xf32>
    %c0_2 = arith.constant 0 : index
    %c0_3 = arith.constant 0 : index
    %2 = vector.load %arg2[%c0_2, %c0_3] : memref<32x256xf32, #tpu.memory_space<vmem>>, vector<32x256xf32>
    %cst = arith.constant dense<0.000000e+00> : vector<16x256xf32>
    %3 = tpu.matmul %1, %2, %cst {dimension_numbers = #tpu.dot_dimension_numbers<[1], [0], [0], [1], [0, 0, 1, 1], [], []>} : vector<16x32xf32>, vector<32x256xf32>, vector<16x256xf32> -> vector<16x256xf32>
    %4 = vector.extract_strided_slice %3 {offsets = [0, 0], sizes = [16, 32], strides = [1, 1]} : vector<16x256xf32> to vector<16x32xf32>
    %5 = vector.extract_strided_slice %3 {offsets = [0, 128], sizes = [16, 32], strides = [1, 1]} : vector<16x256xf32> to vector<16x32xf32>
    %cst_4 = arith.constant dense<0.000000e+00> : vector<16x16xf32>
    %6 = tpu.matmul %4, %5, %cst_4 {dimension_numbers = #tpu.dot_dimension_numbers<[1], [1], [0], [0], [0, 0, 1, 0], [], []>} : vector<16x32xf32>, vector<16x32xf32>, vector<16x16xf32> -> vector<16x16xf32>
    %cst_5 = arith.constant dense<0xFF800000> : vector<16xf32>
    %7 = vector.multi_reduction <maximumf>, %6, %cst_5 [1] : vector<16x16xf32> to vector<16xf32>
    %8 = vector.shape_cast %7 : vector<16xf32> to vector<16x1xf32>
    %9 = vector.broadcast %8 : vector<16x1xf32> to vector<16x16xf32>
    %10 = arith.subf %6, %9 : vector<16x16xf32>
    %11 = math.exp %10 : vector<16x16xf32>
    %cst_6 = arith.constant dense<0.000000e+00> : vector<16xf32>
    %12 = vector.multi_reduction <add>, %11, %cst_6 [1] : vector<16x16xf32> to vector<16xf32>
    %13 = vector.shape_cast %12 : vector<16xf32> to vector<16x1xf32>
    %14 = tpu.reciprocal %13 {approx = true} : vector<16x1xf32> -> vector<16x1xf32>
    %15 = arith.mulf %13, %14 : vector<16x1xf32>
    %cst_7 = arith.constant 2.000000e+00 : f32
    %16 = vector.broadcast %cst_7 : f32 to vector<16x1xf32>
    %17 = arith.subf %16, %15 : vector<16x1xf32>
    %18 = arith.mulf %14, %17 : vector<16x1xf32>
    %19 = arith.mulf %13, %18 : vector<16x1xf32>
    %cst_8 = arith.constant 2.000000e+00 : f32
    %20 = vector.broadcast %cst_8 : f32 to vector<16x1xf32>
    %21 = arith.subf %20, %19 : vector<16x1xf32>
    %22 = arith.mulf %18, %21 : vector<16x1xf32>
    %23 = vector.broadcast %22 : vector<16x1xf32> to vector<16x16xf32>
    %24 = arith.mulf %11, %23 : vector<16x16xf32>
    %c0_9 = arith.constant 0 : index
    %c0_10 = arith.constant 0 : index
    %c0_11 = arith.constant 0 : index
    %25 = vector.load %arg3[%c0_9, %c0_10, %c0_11] : memref<1x16x16xf32, #tpu.memory_space<vmem>>, vector<1x16x16xf32>
    %26 = vector.shape_cast %25 : vector<1x16x16xf32> to vector<16x16xf32>
    %27 = vector.shape_cast %24 : vector<16x16xf32> to vector<1x16x16xf32>
    tpu.vector_store %arg3[%c0_9, %c0_10, %c0_11], %27 {strides = array<i32>} : memref<1x16x16xf32, #tpu.memory_space<vmem>>, vector<1x16x16xf32>,
    return
  }
  func.func @transform_0(%arg0: i32) -> (i32, i32, i32) {
    %c0_i32 = arith.constant 0 : i32
    %c0_i32_0 = arith.constant 0 : i32
    %c0_i32_1 = arith.constant 0 : i32
    return %arg0, %c0_i32, %c0_i32_0 : i32, i32, i32
  }
  func.func @transform_1(%arg0: i32) -> (i32, i32) {
    %c0_i32 = arith.constant 0 : i32
    %c0_i32_0 = arith.constant 0 : i32
    %c0_i32_1 = arith.constant 0 : i32
    return %c0_i32, %c0_i32_0 : i32, i32
  }
  func.func @transform_2(%arg0: i32) -> (i32, i32, i32) {
    %c0_i32 = arith.constant 0 : i32
    %c0_i32_0 = arith.constant 0 : i32
    %c0_i32_1 = arith.constant 0 : i32
    return %arg0, %c0_i32, %c0_i32_0 : i32, i32, i32
  }
}

</mosaic_0001>

<bundles_post_ra>
// kernel: graph_edge_feature.1
= control target key start
LH: loop header
LB: loop body
LE: loop exit
PB: predicated region body
PF: predicated region fallthrough
CT: control target
= control target key end

     0   :  { %7 = vsyncpa [#allocation3], 0  ;;  %s943_s0 = inlined_call_operand.hbm [shape: f32[2,16,32], index: 0, kind: input, shape index: {}]   ;;  %s944_s1 = inlined_call_operand.hbm [shape: f32[32,256], index: 1, kind: input, shape index: {}]   ;;  %s945_s2 = inlined_call_operand.hbm [shape: f32[2,16,16], index: 2, kind: output, shape index: {}]  }
   0x1   :  { %9 = vsyncpa [#allocation3 + $0x1], 0 }
   0x2   :  { %10 = vsyncpa [#allocation6], 0 }
   0x3   :  { %11 = vsyncpa [#allocation4], 0 }
   0x4   :  { %13 = vsyncpa [#allocation4 + $0x1], 0  ;;  %s748_s9 = smov 0   ;;  %s750_s10 = smov 0  }
   0x5   :  { %s752_s11 = smov 0   ;;  %s754_s12 = smov 0  }
   0x6 LB: > { %s769_s13 = sadd.s32 4294967295, %s721_s12   ;;  %s492_s14 = sadd.s32 4294967294, %s721_s12   ;;  %s721_s12 = sphi %s754_s12, %s967_s12   ;;  %s717_s11 = sphi %s752_s11, %s966_s11   ;;  %s713_s10 = sphi %s750_s10, %s965_s10   ;;  %s709_s9 = sphi %s748_s9, %s964_s9  }
   0x7   : > { %p39_p0 = scmp.ne.s32.totalorder %s713_s10, %s709_s9  ;;  %p946_p1 = scmp.eq.s32.totalorder %s769_s13, 0 }
   0x8   : > { %p90_p3 = scmp.eq.s32.totalorder %s492_s14, 1  ;;  %p493_p5 = scmp.ge.s32.totalorder %s721_s12, 1 }
   0x9   : > { %p778_p4 = por %p946_p1, %p39_p0  ;;  %p97_p7 = scmp.lt.s32.totalorder %s721_s12, 3 }
   0xa   : > { %p783_p6 = por %p90_p3, %p39_p0  ;;  %s723_s18 = smov [#allocation5]  }
   0xb   : > { %s950_s15 = scalar_select %p778_p4, 1, 0 }
   0xc   : > { %s951_s16 = scalar_select %p783_p6, 1, 0 }
   0xd   : > { %p788_p8 = pnand %p493_p5, %p97_p7  ;;  %s109_s19 = sshll.u32 %s723_s18, 4  ;;  %s110_s19 = int_to_ptr.vmem [resolvable:$true] %s109_s19 }
   0xe   : > { %s802_s21 = sadd.s32 1, %s721_s12   ;;  %s26_s22 = sadd.s32 1, %s717_s11 }
   0xf   : > { %s952_s17 = scalar_select %p788_p8, 1, 0 }
  0x10   : > { %p535_p9 = pneg %p788_p8  ;;  %s23_s23 = ssub.s32 %s721_s12, %s802_s21 }
  0x11   : > { %s610_s24 = scalar_lea.vmem %s110_s19, 1024  ;;  %p618_p5 = scmp.lt.s32.totalorder %s110_s19, %s110_s19 }
  0x12   : > { %p797_p11 = pnand %p535_p9, %p946_p1  ;;  %p611_p13 = scmp.ne.s32.totalorder %s110_s19, %s610_s24 }
  0x13   : > { %p619_p7 = scmp.lt.s32.totalorder %s610_s24, %s610_s24 }
  0x14   : > { %p601_p12 = pneg %p797_p11 }
  0x15   : > { %p620_p10 = por %p619_p7, %p618_p5 }
  0x16   : > { %p613_p0 = pnand %p611_p13, %p601_p12 }
  0x18   : > { %p614_p3 = pneg %p613_p0 }
  0x1a   : > { %p621_p2 = pnand %p620_p10, %p614_p3 }
  0x1c   : > { %624 = shalt.err (!%p621_p2)
}
  0x1d   : > { %s724_s25 = smov 256   ;;  %s725_s26 = smov 16  }
  0x1e   : > { %538 = dma.hbm_to_vmem [thread:$0]  (!%p797_p11), %s944_s1, 1024, %s110_s19, [#allocation6], %s724_s25, %s724_s25, %s725_s26  }
  0x1f   : > { %p24_p9 = scmp.eq.s32.totalorder %s23_s23, 0  ;;  %p33_p12 = scmp.ne.s32.totalorder %s717_s11, %s713_s10 }
  0x20   : > { %p34_p10 = scmp.eq.s32.totalorder %s721_s12, 0  ;;  %p548_p2 = scmp.lt.s32.totalorder %s721_s12, 2 }
  0x21   : > { %s819_s29 = scalar_select %p24_p9, %s717_s11, %s26_s22  }
  0x22   : > { %p35_p13 = por %p34_p10, %p33_p12  ;;  %p954_p0 = scmp.eq.s32.totalorder %s769_s13, 1 }
  0x23   : > { %s123_s3 = sand.u32 1, %s717_s11   ;;  %s514_s4 = sshll.u32 %s721_s12, 8 }
  0x24   : > { %p823_p3 = por %p954_p0, %p33_p12  ;;  %s496_s5 = sshll.u32 %s123_s3, 4 }
  0x25   : > { %s832_s8 = scalar_lea.hbm %s943_s0, %s514_s4  ;;  %s127_s14 = scalar_lea.vmem [#allocation2], %s496_s5 }
  0x26   : > { %s955_s30 = scalar_select %p823_p3, 1, 0 }
  0x27   : > { %s134_s18 = sshll.u32 %s127_s14, 4  ;;  %p834_p11 = pnand %p548_p2, %p35_p13  ;;  %s838_s18 = int_to_ptr.vmem [resolvable:$true] %s134_s18 }
  0x28   : > { %s840_s20 = scalar_lea.sflag [#allocation3], %s123_s3  ;;  %s625_s22 = scalar_lea.hbm %s832_s8, 256 }
  0x29   : > { %p626_p5 = scmp.ne.s32.totalorder %s832_s8, %s625_s22  ;;  %p627_p7 = pneg %p834_p11 }
  0x2a   : > { %s630_s25 = scalar_lea.hbm %s943_s0, 512  ;;  %p631_p10 = scmp.lt.s32.totalorder %s832_s8, %s943_s0 }
  0x2b   : > { %p628_p9 = pnand %p627_p7, %p626_p5  ;;  %p632_p2 = scmp.lt.s32.totalorder %s630_s25, %s625_s22 }
  0x2d   : > { %p629_p12 = pneg %p628_p9  ;;  %p633_p13 = por %p632_p2, %p631_p10 }
  0x2f   : > { %p634_p0 = pnand %p633_p13, %p629_p12 }
  0x31   : > { %637 = shalt.err (!%p634_p0)
}
  0x32   : > { %s638_s28 = scalar_lea.vmem %s838_s18, 256  ;;  %s726_s3 = smov [#allocation2]  }
  0x33   : > { %p639_p1 = scmp.ne.s32.totalorder %s838_s18, %s638_s28  ;;  %s643_s4 = sshll.u32 %s726_s3, 4  ;;  %s644_s4 = int_to_ptr.vmem [resolvable:$false] %s643_s4 }
  0x34   : > { %s645_s5 = scalar_lea.vmem %s644_s4, 512  ;;  %p646_p9 = scmp.lt.s32.totalorder %s838_s18, %s644_s4 }
  0x35   : > { %p641_p6 = pnand %p639_p1, %p627_p7  ;;  %p647_p3 = scmp.lt.s32.totalorder %s645_s5, %s638_s28 }
  0x37   : > { %p642_p5 = pneg %p641_p6  ;;  %p648_p4 = por %p647_p3, %p646_p9 }
  0x39   : > { %p649_p8 = pnand %p648_p4, %p642_p5 }
  0x3b   : > { %652 = shalt.err (!%p649_p8)
}
  0x3c   : > { %s727_s6 = smov 128   ;;  %s728_s7 = smov 8  }
  0x3d   : > { %542 = dma.hbm_to_vmem [thread:$0]  (!%p834_p11), %s832_s8, 256, %s838_s18, %s840_s20, %s727_s6, %s727_s6, %s728_s7  }
  0x3e   : > { %p957_p1 = scmp.ne.s32.totalorder %s952_s17, 0 }
  0x3f   : > { %s864_s14 = sand.u32 (!%p957_p1), 1, %s713_s10   ;;  %p958_p4 = scmp.ne.s32.totalorder (!%p957_p1), %s950_s15, 0 }
  0x40   : > { %146 = sbr.rel (%p957_p1) target bundleno = 826 (0x33a), region = 28  ;;  %s500_s22 = sshll.u32 (!%p957_p1), %s864_s14, 4 }
  0x41   : > { %s149_s23 = scalar_lea.sflag (!%p957_p1), [#allocation3], %s864_s14  ;;  %s152_s24 = scalar_lea.vmem (!%p957_p1), [#allocation2], %s500_s22 }
  0x45   : > { %696 = dma.done.wait (%p958_p4), %s149_s23, 256  }
  0x46   : > { %698 = vsyncadd (%p958_p4), %s149_s23, 4294967040  ;;  %p959_p6 = scmp.eq.s32.totalorder %s769_s13, 0 }
  0x48   : > { %700 = dma.done.wait (%p959_p6), [#allocation6], 1024   ;;  %p960_p8 = pmov %p959_p6 }
  0x49   : > { %v729_v0 = vmov 0.0   ;;  %v186_v1 = vld [vmem:[#allocation5 + $0x38] sm:$0xff]  ;;  %v185_v2 = vld [vmem:[#allocation5 + $0x30] sm:$0xff]  ;;  %v184_v3 = vld [vmem:[#allocation5 + $0x28] sm:$0xff]  ;;  %vm187_vm0 = vcmask 261120   ;;  %vm358_vm1 = vcmask 130048  }
  0x4a   : > { %702 = vsyncadd (%p960_p8), [#allocation6], 4294966272  ;;  %258 = vmatprep.mubr.f32.mxu0 %v729_v0  ;;  %218 = vmatprep.subr.mxu0 %v186_v1  ;;  %v183_v4 = vld [vmem:[#allocation5 + $0x20] sm:$0xff]  ;;  %v182_v5 = vld [vmem:[#allocation5 + $0x18] sm:$0xff]  ;;  %s515_s15 = sshll.u32 %s769_s13, 8  ;;  %s176_s17 = scalar_lea.vmem [#allocation7], %s500_s22 }
  0x4b   : > { %219 = vmatpush1.msra.mxu0 %v185_v2  ;;  %v181_v6 = vld [vmem:[#allocation5 + $0x10] sm:$0xff]  ;;  %v180_v7 = vld [vmem:[#allocation5 + $0x8] sm:$0xff]  ;;  %v179_v8 = vld [vmem:[#allocation5] sm:$0xff]  ;;  %s409_s8 = sshll.u32 %s176_s17, 4  ;;  %s897_s20 = scalar_lea.hbm %s945_s2, %s515_s15  ;;  %s899_s8 = int_to_ptr.vmem [resolvable:$true] %s409_s8 }
  0x4c   : > { %220 = vmatprep.subr.mxu0 %v184_v3  ;;  %v177_v9 = vld [vmem:[%s152_s24] sm:$0xff]  ;;  %v178_v10 = vld [vmem:[%s152_s24 + $0x8] sm:$0xff]  ;;  %s396_s13 = scalar_lea.sflag [#allocation4], %s864_s14  ;;  %s653_s25 = scalar_lea.vmem %s899_s8, 256 }
  0x4d   : > { %221 = vmatpush1.msra.mxu0 %v183_v4  ;;  %p654_p3 = scmp.ne.s32.totalorder %s899_s8, %s653_s25  ;;  %p961_p11 = scmp.ne.s32.totalorder %s955_s30, 0 }
  0x4e   : > { %222 = vmatprep.subr.mxu0 %v182_v5  ;;  %s730_s26 = smov [#allocation7]  }
  0x4f   : > { %223 = vmatpush1.msra.mxu0 %v181_v6  ;;  %p655_p7 = pnand %p654_p3, %p961_p11  ;;  %s657_s27 = sshll.u32 %s730_s26, 4  ;;  %s658_s27 = int_to_ptr.vmem [resolvable:$false] %s657_s27 }
  0x50   : > { %224 = vmatprep.subr.mxu0 %v180_v7  ;;  %s659_s28 = scalar_lea.vmem %s658_s27, 512  ;;  %p660_p10 = scmp.lt.s32.totalorder %s899_s8, %s658_s27 }
  0x51   : > { %225 = vmatpush1.msra.mxu0 %v179_v8  ;;  %p656_p12 = pneg %p655_p7  ;;  %p661_p2 = scmp.lt.s32.totalorder %s659_s28, %s653_s25 }
  0x52   : > { %503 = vmatmul.mubr.msk.f32.vlgmr.msra.gmra.mxu0 %vm187_vm0, %v177_v9 }
  0x53   : > { %264 = vmatprep.mubr.f32.mxu0 %v729_v0  ;;  %p662_p13 = por %p661_p2, %p660_p10 }
  0x55   : > { %p663_p0 = pnand %p662_p13, %p656_p12 }
  0x56   : > { %504 = vmatmul.mubr.msk.f32.gmra.mxu0 %vm187_vm0, %v178_v10 }
 0x112   : > { %v260_v11 = vpop.f32.mrf.mxu0 }
 0x113   : > { %524 = vmatprep.mubr.msk.f32.mxu1 %vm187_vm0, %v260_v11 }
 0x114   : > { %v262_v12 = vpop.f32.mrf.mxu0 }
 0x116   : > { %v266_v13 = vpop.f32.mrf.mxu0 }
 0x118   : > { %v268_v14 = vpop.f32.mrf.mxu0 }
 0x119   : > { %520 = vmatprep.subr.msk.mxu1 %vm187_vm0, %v268_v14 }
 0x11a   : > { %521 = vmatpush3.xpose.msk.msra.mxu1 %vm187_vm0, %v268_v14 }
 0x11b   : > { %522 = vmatprep.subr.msk.mxu1 %vm187_vm0, %v262_v12 }
 0x11e   : > { %523 = vmatpush3.xpose.msk.msra.mxu1 %vm187_vm0, %v262_v12 }
 0x121   : > { %525 = vmatmul.mubr.msk.f32.vlgmr.msra.gmra.mxu1 %vm187_vm0, %v266_v13 }
 0x1e1   : > { %v526_v15 = vpop.f32.mrf.mxu1 }
 0x1e2   : > { %v362_v18 = vsel %vm358_vm1, %v526_v15, -inf }
 0x1e3   : > { %v349_v16 = vpop.f32.mrf.mxu1 }
 0x1e4   : > { %v359_v17 = vsel %vm358_vm1, %v349_v16, -inf }
 0x1e5   : > { %360 = vmax.xlane.f32.xlu0 %v359_v17 }
 0x1e9   : > { %363 = vmax.xlane.f32.xlu0 %v362_v18 }
 0x26e   : > { %v361_v19 = vpop.xlane.xlu0 %360 }
 0x26f   : > { %v365_v20 = vsub.f32 %v349_v16, %v361_v19 }
 0x271   : > { %v367_v21 = vmul.f32 1.442695, %v365_v20 }
 0x272   : > { %v364_v22 = vpop.xlane.xlu0 %363 }
 0x273   : > { %591 = vpow2.f32 %v367_v21  ;;  %v366_v23 = vsub.f32 %v526_v15, %v364_v22 }
 0x275   : > { %v369_v24 = vmul.f32 1.442695, %v366_v23 }
 0x277   : > { %593 = vpow2.f32 %v369_v24 }
 0x280   : > { %v592_v25 = vpop.eup %591 }
 0x281   : > { %v371_v26 = vsel %vm358_vm1, %v592_v25, 0.0 }
 0x282   : > { %372 = vadd.xlane.f32.xlu1 %v371_v26 }
 0x284   : > { %v594_v27 = vpop.eup %593 }
 0x285   : > { %v374_v28 = vsel %vm358_vm1, %v594_v27, 0.0 }
 0x286   : > { %375 = vadd.xlane.f32.xlu1 %v374_v28 }
 0x30b   : > { %v373_v29 = vpop.xlane.xlu1 %372 }
 0x30c   : > { %595 = vrcp.f32 %v373_v29 }
 0x30f   : > { %v376_v30 = vpop.xlane.xlu1 %375 }
 0x310   : > { %597 = vrcp.f32 %v376_v30 }
 0x319   : > { %v596_v31 = vpop.eup %595 }
 0x31a   : > { %v379_v32 = vmul.f32 %v596_v31, %v373_v29 }
 0x31c   : > { %v381_v33 = vsub.f32 2.0, %v379_v32 }
 0x31d   : > { %v598_v34 = vpop.eup %597 }
 0x31e   : > { %v383_v35 = vmul.f32 %v596_v31, %v381_v33  ;;  %v380_v36 = vmul.f32 %v598_v34, %v376_v30 }
 0x320   : > { %v385_v37 = vmul.f32 %v383_v35, %v373_v29  ;;  %v382_v38 = vsub.f32 2.0, %v380_v36 }
 0x322   : > { %v387_v39 = vsub.f32 2.0, %v385_v37  ;;  %v384_v40 = vmul.f32 %v598_v34, %v382_v38 }
 0x324   : > { %v389_v41 = vmul.f32 %v387_v39, %v383_v35  ;;  %v386_v42 = vmul.f32 %v384_v40, %v376_v30 }
 0x326   : > { %v391_v43 = vmul.f32 %v592_v25, %v389_v41  ;;  %v388_v44 = vsub.f32 2.0, %v386_v42 }
 0x328   : > { %v390_v45 = vmul.f32 %v388_v44, %v384_v40  ;;  %393 = vst.msk [vmem:[%s176_s17] sm:$0xff] %vm358_vm1, %v391_v43 }
 0x32a   : > { %v392_v46 = vmul.f32 %v594_v27, %v390_v45 }
 0x32c   : > { %394 = vst.msk [vmem:[%s176_s17 + $0x8] sm:$0xff] %vm358_vm1, %v392_v46 }
 0x32d   : > { %666 = shalt.err (!%p663_p0)
}
 0x32e   : > { %s667_s3 = scalar_lea.hbm %s897_s20, 256  ;;  %s671_s6 = scalar_lea.hbm %s945_s2, 512 }
 0x32f   : > { %p668_p5 = scmp.ne.s32.totalorder %s897_s20, %s667_s3  ;;  %p672_p4 = scmp.lt.s32.totalorder %s897_s20, %s945_s2 }
 0x330   : > { %p673_p6 = scmp.lt.s32.totalorder %s671_s6, %s667_s3 }
 0x331   : > { %p669_p9 = pnand %p668_p5, %p961_p11 }
 0x332   : > { %p674_p8 = por %p673_p6, %p672_p4 }
 0x333   : > { %p670_p1 = pneg %p669_p9 }
 0x335   : > { %p675_p3 = pnand %p674_p8, %p670_p1 }
 0x337   : > { %678 = shalt.err (!%p675_p3)
}
 0x338   : > { %s731_s23 = smov 128   ;;  %s732_s24 = smov 8  }
 0x339   : > { %533 = dma.vmem_to_hbm [thread:$0]  (%p961_p11), %s899_s8, 256, %s897_s20, %s396_s13, %s731_s23, %s731_s23, %s732_s24  }
 0x33a PF: > { %s424_s15 = sand.u32 1, %s709_s9   ;;  %p962_p7 = scmp.ne.s32.totalorder %s951_s16, 0 }
 0x33b   : > { %p963_p12 = scmp.ge.s32.totalorder %s721_s12, 2  ;;  %s425_s17 = scalar_lea.sflag [#allocation4], %s424_s15 }
 0x33d   : > { %p544_p10 = pnand %p963_p12, %p962_p7 }
 0x33f   : > { %p545_p2 = pneg %p544_p10 }
 0x341   : > { %704 = dma.done.wait (%p545_p2), %s425_s17, 256  }
 0x342   : > { %706 = vsyncadd (%p545_p2), %s425_s17, 4294967040  ;;  %p16_p13 = scmp.ge.s32.totalorder %s802_s21, 4   ;;  %s964_s9 = smov %s713_s10 }
 0x343   : > { %s965_s10 = smov %s717_s11  ;;  %s966_s11 = smov %s819_s29 }
 0x344   : > { %s967_s12 = smov %s802_s21  ;;  %18 = sbr.rel (!%p16_p13) target bundleno = 6 (0x6), region = 77 }
 0x349   :  { %430 = vsyncpa [#allocation3], 1 }
 0x34a   :  { %432 = vsyncpa [#allocation3 + $0x1], 1 }
 0x34b   :  { %433 = vsyncpa [#allocation6], 1 }
 0x34c   :  { %434 = vsyncpa [#allocation4], 1 }
 0x34d   :  { %436 = vsyncpa [#allocation4 + $0x1], 1 }

</bundles_post_ra>
